<compile_context>
chip_gen: v7x
topology: tpu7x:2x2x1
jax: 0.10.0
libtpu: 0.0.40
codegen_flags: <defaults>
</compile_context>

<pallas_src>
import functools

import jax
import jax.numpy as jnp
from jax import lax
from jax.experimental import pallas as pl
from jax.experimental.pallas import tpu as pltpu

LANES = 128
SUBLANES = 8


def _round_up(x, m):
    return -(-x // m) * m


def _sublane_align(dtype):
    """Native sublane tiling for a dtype: 8 (f32), 16 (bf16), 32 (int8)."""
    return max(SUBLANES, (4 * SUBLANES) // jnp.dtype(dtype).itemsize)


def _num_tensorcores_per_chip():
    """2 on v7x-style megacore parts, 1 on v5e/v6e (conservative default 1)."""
    try:
        kind = jax.devices()[0].device_kind.lower()
    except Exception:
        return 1
    return 2 if ("v7" in kind or "7x" in kind) else 1


def _pow_gamma(pt, gamma):
    """Specialize pt**gamma at trace time (avoid exp/log for integer gammas)."""
    g = float(gamma)
    if g == 0.0:
        return jnp.ones_like(pt)
    if g == 1.0:
        return pt
    if g.is_integer() and 0.0 < g <= 8.0:
        r = pt
        for _ in range(int(g) - 1):
            r = r * pt
        return r
    return pt ** g


def _elementwise_focal(x, t, gamma, alpha):
    """Per-element sigmoid focal loss (f32 in / f32 out), VALU-lean form."""
    # One exp(-|x|) shared between the stable sigmoid, pt and the stable BCE.
    e = jnp.exp(-jnp.abs(x))
    d = 1.0 + e
    r = pl.reciprocal(d, approx=True)        # EUP slot (VALU is the tight one)
    inv = r * (2.0 - d * r)                  # one Newton step -> ~f32 accuracy
    p = jnp.where(x >= 0, inv, e * inv)      # == sigmoid(x)
    pt = p + t * (1.0 - 2.0 * p)             # == (1-p)*t + p*(1-t)
    alpha_w = (2.0 * alpha - 1.0) * t + (1.0 - alpha)   # == a*t + (1-a)*(1-t)
    focal_w = alpha_w * _pow_gamma(pt, gamma)
    bce = jnp.maximum(x, 0.0) - x * t + jnp.log1p(e)
    return bce * focal_w


def _focal_sum_kernel(n_ref, preds_ref, targets_ref, out_ref, acc_ref,
                      *, gamma, alpha, tile_rows, steps):
    i = pl.program_id(0)   # core-split ("parallel") axis
    j = pl.program_id(1)   # reduction ("arbitrary") axis

    @pl.when(j == 0)
    def _():
        acc_ref[...] = jnp.zeros_like(acc_ref)

    tile_elems = tile_rows * LANES
    tile_idx = i * steps + j
    rem = n_ref[0] - tile_idx * tile_elems        # scalar (SMEM read)

    x = preds_ref[...].astype(jnp.float32)
    t = targets_ref[...].astype(jnp.float32)

    def _accumulate(loss):
        # Lane/sublane-resident partial sums: pure VPU adds of full vregs;
        # the cross-lane reduction is deferred to JAX on the tiny output.
        acc_ref[...] += loss.reshape(
            tile_rows // SUBLANES, SUBLANES, LANES).sum(axis=0)

    @pl.when(rem >= tile_elems)
    def _():
        # Fast path: full tile, no validity mask (saves ~5-6 VALU ops/elem).
        _accumulate(_elementwise_focal(x, t, gamma, alpha))

    @pl.when(rem < tile_elems)
    def _():
        # Tail / overrun tile: mask lanes past the true element count. The
        # select runs AFTER bce*focal_w, so any NaN/Inf from uninitialized
        # partial-block data is discarded rather than propagated.
        loss = _elementwise_focal(x, t, gamma, alpha)
        row = lax.broadcasted_iota(jnp.int32, x.shape, 0)
        lane = lax.broadcasted_iota(jnp.int32, x.shape, 1)
        valid = (row * LANES + lane) < rem
        _accumulate(jnp.where(valid, loss, 0.0))

    @pl.when(j == pl.num_programs(1) - 1)
    def _():
        out_ref[0] = acc_ref[...]


def _focal_loss_sum(preds, targets, gamma, alpha, *, tile_rows=4096):
    """Returns the scalar SUM of the elementwise sigmoid focal loss."""
    n = int(preds.size)
    assert 0 < n < 2 ** 31, "int32 in-kernel element counter would overflow"

    # Flatten in native dtype (bf16/uint8 pass-through keeps HBM bytes low;
    # the kernel upcasts to f32 internally).
    flat_p = jnp.ravel(preds)
    flat_t = jnp.ravel(targets)

    align = max(_sublane_align(flat_p.dtype), _sublane_align(flat_t.dtype))

    # Pad ONLY to a lane-dense (rows, 128) slab; tiny inputs additionally pad
    # up to one native sublane tile so a block never exceeds the array. For
    # 128-aligned inputs (the common case) this is a zero-copy reshape — no
    # whole-tile padding, the grid's last block is a partial edge block.
    rows = -(-n // LANES)
    padded_rows = max(rows, align)
    pad = padded_rows * LANES - n
    if pad:
        flat_p = jnp.pad(flat_p, (0, pad))
        flat_t = jnp.pad(flat_t, (0, pad))
    p2 = flat_p.reshape(padded_rows, LANES)
    t2 = flat_t.reshape(padded_rows, LANES)

    # Tile: as large as useful, multiple of the native sublane tiling, never
    # larger than the (down-aligned) row count so block starts stay in-bounds.
    tr = min(_round_up(int(tile_rows), align), (padded_rows // align) * align)
    tr = max(tr, align)
    num_tiles = -(-padded_rows // tr)

    # Core-split axis only where there are 2 TensorCores AND >=2 tiles.
    p_cores = 2 if (_num_tensorcores_per_chip() == 2 and num_tiles >= 2) else 1
    steps = -(-num_tiles // p_cores)

    # Clamp the block index of the (at most one) overrun tile created by the
    # core-split rounding; its contribution is zeroed in-kernel (rem <= 0),
    # so no wrapper-side padding is ever needed for it.
    def _in_map(i, j, n_s):
        return (jnp.minimum(i * steps + j, num_tiles - 1), 0)

    n_arr = jnp.array([n], jnp.int32)
    kernel = functools.partial(_focal_sum_kernel, gamma=float(gamma),
                               alpha=float(alpha), tile_rows=tr, steps=steps)

    in_bytes = (p2.size * p2.dtype.itemsize + t2.size * t2.dtype.itemsize)
    cost = pl.CostEstimate(
        flops=22 * n,
        transcendentals=3 * n,
        bytes_accessed=in_bytes + p_cores * SUBLANES * LANES * 4)

    partial_sums = pl.pallas_call(
        kernel,
        out_shape=jax.ShapeDtypeStruct((p_cores, SUBLANES, LANES), jnp.float32),
        grid_spec=pltpu.PrefetchScalarGridSpec(
            num_scalar_prefetch=1,
            grid=(p_cores, steps),
            in_specs=[
                pl.BlockSpec((tr, LANES), _in_map),
                pl.BlockSpec((tr, LANES), _in_map),
            ],
            out_specs=pl.BlockSpec((1, SUBLANES, LANES),
                                   lambda i, j, n_s: (i, 0, 0)),
            scratch_shapes=[pltpu.VMEM((SUBLANES, LANES), jnp.float32)],
        ),
        compiler_params=pltpu.CompilerParams(
            # TODO(synk): confirm via xprof that the leading axis shards across
            # the two v7x TensorCores; if not, switch to pltpu.CORE_PARALLEL.
            dimension_semantics=("parallel", "arbitrary"),
            vmem_limit_bytes=32 * 1024 * 1024),
        cost_estimate=cost,
    )(n_arr, p2, t2)
    return jnp.sum(partial_sums)


class FocalLoss:
    """JAX/Pallas equivalent of the PyTorch FocalLoss module (forward only)."""

    def __init__(self, gamma=2.0, alpha=0.25, size_average=True,
                 loss_weight=1.0, tile_rows=4096, **kwargs):
        self.gamma = float(gamma)
        self.alpha = float(alpha)
        self.size_average = size_average
        self.loss_weight = float(loss_weight)
        self.tile_rows = int(tile_rows)

    def __call__(self, preds, targets, avg_factor=None):
        total = _focal_loss_sum(preds, targets, self.gamma, self.alpha,
                                tile_rows=self.tile_rows)
        n = preds.size
        if avg_factor is None:
            loss = total / n if self.size_average else total
        else:
            loss = total / avg_factor if self.size_average else total
        return self.loss_weight * loss


def _reference_focal_loss_sum(preds, targets, gamma, alpha):
    x = preds.astype(jnp.float32)
    t = targets.astype(jnp.float32)
    p = jax.nn.sigmoid(x)
    pt = (1.0 - p) * t + p * (1.0 - t)
    w = (alpha * t + (1.0 - alpha) * (1.0 - t)) * (pt ** gamma)
    bce = jnp.maximum(x, 0.0) - x * t + jnp.log1p(jnp.exp(-jnp.abs(x)))
    return (bce * w).sum()


if __name__ == "__main__":
    key = jax.random.PRNGKey(0)
    k1, k2, k3, k4, k5, k6 = jax.random.split(key, 6)

    module = FocalLoss(gamma=2.0, alpha=0.25, size_average=True, loss_weight=1.0)

    # 1) NCHW logits + binary targets; 128-aligned size -> zero-copy fast path.
    B, C, H, W = 2, 4, 16, 16
    preds = jax.random.normal(k1, (B, C, H, W), dtype=jnp.float32) * 2.0
    targets = (jax.random.uniform(k2, (B, C, H, W)) > 0.5).astype(jnp.float32)
    loss = jax.block_until_ready(module(preds, targets))
    ref = module.loss_weight * _reference_focal_loss_sum(
        preds, targets, 2.0, 0.25) / preds.size
    assert jnp.allclose(loss, ref, rtol=1e-4, atol=1e-6), (loss, ref)

    # 2) Ragged size + avg_factor (exercises the in-kernel tail mask).
    preds_r = jax.random.normal(k3, (2, 3, 7, 5), dtype=jnp.float32) * 2.0
    targets_r = (jax.random.uniform(k4, (2, 3, 7, 5)) > 0.5).astype(jnp.float32)
    loss_r = jax.block_until_ready(module(preds_r, targets_r, avg_factor=37.0))
    ref_r = module.loss_weight * _reference_focal_loss_sum(
        preds_r, targets_r, 2.0, 0.25) / 37.0
    assert jnp.allclose(loss_r, ref_r, rtol=1e-4, atol=1e-6), (loss_r, ref_r)

    # 3) bf16 pass-through (native-dtype slabs; kernel upcasts to f32).
    preds_b = (jax.random.normal(k5, (B, C, H, W), dtype=jnp.float32) * 2.0
               ).astype(jnp.bfloat16)
    targets_b = (jax.random.uniform(k6, (B, C, H, W)) > 0.5).astype(jnp.bfloat16)
    loss_b = jax.block_until_ready(module(preds_b, targets_b))
    ref_b = _reference_focal_loss_sum(
        preds_b.astype(jnp.float32), targets_b.astype(jnp.float32),
        2.0, 0.25) / preds_b.size
    assert jnp.allclose(loss_b, ref_b, rtol=1e-3, atol=1e-5), (loss_b, ref_b)

    # 4) Multi-tile reduction + partial edge block + sum path (tiny tile size
    #    to exercise the grid at small shapes).
    module_mt = FocalLoss(gamma=2.0, alpha=0.25, size_average=False,
                          loss_weight=0.5, tile_rows=8)
    preds_m = jax.random.normal(k1, (2, 3, 17, 13), dtype=jnp.float32) * 2.0
    targets_m = (jax.random.uniform(k2, (2, 3, 17, 13)) > 0.5).astype(jnp.float32)
    loss_m = jax.block_until_ready(module_mt(preds_m, targets_m))
    ref_m = 0.5 * _reference_focal_loss_sum(preds_m, targets_m, 2.0, 0.25)
    assert jnp.allclose(loss_m, ref_m, rtol=1e-4, atol=1e-5), (loss_m, ref_m)

    print("KERNEL_OK")
</pallas_src>

<mosaic_0001>
module attributes {stable_mosaic.version = 11 : i64} {
  func.func @_focal_sum_kernel(%arg0: i32, %arg1: i32, %arg2: memref<1xi32, #tpu.memory_space<smem>>, %arg3: memref<16x128xf32, #tpu.memory_space<vmem>>, %arg4: memref<16x128xf32, #tpu.memory_space<vmem>>, %arg5: memref<1x8x128xf32, #tpu.memory_space<vmem>>, %arg6: memref<8x128xf32, #tpu.memory_space<vmem>>) attributes {dimension_semantics = [#tpu.dimension_semantics<parallel>, #tpu.dimension_semantics<arbitrary>], iteration_bounds = array<i64: 1, 1>, scalar_prefetch = 1 : i64, scratch_operands = 1 : i64, tpu.core_type = #tpu.core_type<tc>, window_params = [{transform_indices = @transform_0, window_bounds = array<i64: 16, 128>}, {transform_indices = @transform_1, window_bounds = array<i64: 16, 128>}, {transform_indices = @transform_2, window_bounds = array<i64: 1, 8, 128>}]} {
    %c0_i32 = arith.constant 0 : i32
    %0 = arith.cmpi eq, %arg1, %c0_i32 : i32
    %1 = arith.extui %0 : i1 to i32
    %c0_i32_0 = arith.constant 0 : i32
    %2 = arith.cmpi ne, %1, %c0_i32_0 : i32
    scf.if %2 {
      %cst = arith.constant 0.000000e+00 : f32
      %19 = vector.broadcast %cst : f32 to vector<8x128xf32>
      %c0_11 = arith.constant 0 : index
      %c0_12 = arith.constant 0 : index
      %20 = vector.load %arg6[%c0_11, %c0_12] : memref<8x128xf32, #tpu.memory_space<vmem>>, vector<8x128xf32>
      tpu.vector_store %arg6[%c0_11, %c0_12], %19 {strides = array<i32>} : memref<8x128xf32, #tpu.memory_space<vmem>>, vector<8x128xf32>,
    } else {
    }
    %c1_i32 = arith.constant 1 : i32
    %3 = arith.muli %arg0, %c1_i32 : i32
    %4 = arith.addi %3, %arg1 : i32
    %c0 = arith.constant 0 : index
    %5 = memref.load %arg2[%c0] : memref<1xi32, #tpu.memory_space<smem>>
    %c2048_i32 = arith.constant 2048 : i32
    %6 = arith.muli %4, %c2048_i32 : i32
    %7 = arith.subi %5, %6 : i32
    %c0_1 = arith.constant 0 : index
    %c0_2 = arith.constant 0 : index
    %8 = vector.load %arg3[%c0_1, %c0_2] : memref<16x128xf32, #tpu.memory_space<vmem>>, vector<16x128xf32>
    %c0_3 = arith.constant 0 : index
    %c0_4 = arith.constant 0 : index
    %9 = vector.load %arg4[%c0_3, %c0_4] : memref<16x128xf32, #tpu.memory_space<vmem>>, vector<16x128xf32>
    %c2048_i32_5 = arith.constant 2048 : i32
    %10 = arith.cmpi sge, %7, %c2048_i32_5 : i32
    %11 = arith.extui %10 : i1 to i32
    %c0_i32_6 = arith.constant 0 : i32
    %12 = arith.cmpi ne, %11, %c0_i32_6 : i32
    scf.if %12 {
      %19 = math.absf %8 : vector<16x128xf32>
      %cst = arith.constant 0.000000e+00 : f32
      %20 = vector.broadcast %cst : f32 to vector<16x128xf32>
      %21 = arith.subf %20, %19 : vector<16x128xf32>
      %22 = math.exp %21 : vector<16x128xf32>
      %cst_11 = arith.constant 1.000000e+00 : f32
      %23 = vector.broadcast %cst_11 : f32 to vector<16x128xf32>
      %24 = arith.addf %23, %22 : vector<16x128xf32>
      %25 = tpu.reciprocal %24 {approx = true} : vector<16x128xf32> -> vector<16x128xf32>
      %26 = arith.mulf %24, %25 : vector<16x128xf32>
      %cst_12 = arith.constant 2.000000e+00 : f32
      %27 = vector.broadcast %cst_12 : f32 to vector<16x128xf32>
      %28 = arith.subf %27, %26 : vector<16x128xf32>
      %29 = arith.mulf %25, %28 : vector<16x128xf32>
      %cst_13 = arith.constant 0.000000e+00 : f32
      %30 = vector.broadcast %cst_13 : f32 to vector<16x128xf32>
      %31 = arith.cmpf oge, %8, %30 : vector<16x128xf32>
      %32 = arith.mulf %22, %29 : vector<16x128xf32>
      %33 = arith.select %31, %29, %32 : vector<16x128xi1>, vector<16x128xf32>
      %cst_14 = arith.constant 2.000000e+00 : f32
      %34 = vector.broadcast %cst_14 : f32 to vector<16x128xf32>
      %35 = arith.mulf %34, %33 : vector<16x128xf32>
      %cst_15 = arith.constant 1.000000e+00 : f32
      %36 = vector.broadcast %cst_15 : f32 to vector<16x128xf32>
      %37 = arith.subf %36, %35 : vector<16x128xf32>
      %38 = arith.mulf %9, %37 : vector<16x128xf32>
      %39 = arith.addf %33, %38 : vector<16x128xf32>
      %cst_16 = arith.constant -5.000000e-01 : f32
      %40 = vector.broadcast %cst_16 : f32 to vector<16x128xf32>
      %41 = arith.mulf %40, %9 : vector<16x128xf32>
      %cst_17 = arith.constant 7.500000e-01 : f32
      %42 = vector.broadcast %cst_17 : f32 to vector<16x128xf32>
      %43 = arith.addf %41, %42 : vector<16x128xf32>
      %44 = arith.mulf %39, %39 : vector<16x128xf32>
      %45 = arith.mulf %43, %44 : vector<16x128xf32>
      %cst_18 = arith.constant 0.000000e+00 : f32
      %46 = vector.broadcast %cst_18 : f32 to vector<16x128xf32>
      %47 = arith.maximumf %8, %46 : vector<16x128xf32>
      %48 = arith.mulf %8, %9 : vector<16x128xf32>
      %49 = arith.subf %47, %48 : vector<16x128xf32>
      %50 = math.log1p %22 : vector<16x128xf32>
      %51 = arith.addf %49, %50 : vector<16x128xf32>
      %52 = arith.mulf %51, %45 : vector<16x128xf32>
      %c0_19 = arith.constant 0 : index
      %c0_20 = arith.constant 0 : index
      %53 = vector.load %arg6[%c0_19, %c0_20] : memref<8x128xf32, #tpu.memory_space<vmem>>, vector<8x128xf32>
      %54 = vector.shape_cast %52 : vector<16x128xf32> to vector<2x8x128xf32>
      %cst_21 = arith.constant dense<0.000000e+00> : vector<8x128xf32>
      %55 = vector.multi_reduction <add>, %54, %cst_21 [0] : vector<2x8x128xf32> to vector<8x128xf32>
      %56 = arith.addf %53, %55 : vector<8x128xf32>
      %c0_22 = arith.constant 0 : index
      %c0_23 = arith.constant 0 : index
      %57 = vector.load %arg6[%c0_22, %c0_23] : memref<8x128xf32, #tpu.memory_space<vmem>>, vector<8x128xf32>
      tpu.vector_store %arg6[%c0_22, %c0_23], %56 {strides = array<i32>} : memref<8x128xf32, #tpu.memory_space<vmem>>, vector<8x128xf32>,
    } else {
    }
    %c2048_i32_7 = arith.constant 2048 : i32
    %13 = arith.cmpi slt, %7, %c2048_i32_7 : i32
    %14 = arith.extui %13 : i1 to i32
    %c0_i32_8 = arith.constant 0 : i32
    %15 = arith.cmpi ne, %14, %c0_i32_8 : i32
    scf.if %15 {
      %19 = math.absf %8 : vector<16x128xf32>
      %cst = arith.constant 0.000000e+00 : f32
      %20 = vector.broadcast %cst : f32 to vector<16x128xf32>
      %21 = arith.subf %20, %19 : vector<16x128xf32>
      %22 = math.exp %21 : vector<16x128xf32>
      %cst_11 = arith.constant 1.000000e+00 : f32
      %23 = vector.broadcast %cst_11 : f32 to vector<16x128xf32>
      %24 = arith.addf %23, %22 : vector<16x128xf32>
      %25 = tpu.reciprocal %24 {approx = true} : vector<16x128xf32> -> vector<16x128xf32>
      %26 = arith.mulf %24, %25 : vector<16x128xf32>
      %cst_12 = arith.constant 2.000000e+00 : f32
      %27 = vector.broadcast %cst_12 : f32 to vector<16x128xf32>
      %28 = arith.subf %27, %26 : vector<16x128xf32>
      %29 = arith.mulf %25, %28 : vector<16x128xf32>
      %cst_13 = arith.constant 0.000000e+00 : f32
      %30 = vector.broadcast %cst_13 : f32 to vector<16x128xf32>
      %31 = arith.cmpf oge, %8, %30 : vector<16x128xf32>
      %32 = arith.mulf %22, %29 : vector<16x128xf32>
      %33 = arith.select %31, %29, %32 : vector<16x128xi1>, vector<16x128xf32>
      %cst_14 = arith.constant 2.000000e+00 : f32
      %34 = vector.broadcast %cst_14 : f32 to vector<16x128xf32>
      %35 = arith.mulf %34, %33 : vector<16x128xf32>
      %cst_15 = arith.constant 1.000000e+00 : f32
      %36 = vector.broadcast %cst_15 : f32 to vector<16x128xf32>
      %37 = arith.subf %36, %35 : vector<16x128xf32>
      %38 = arith.mulf %9, %37 : vector<16x128xf32>
      %39 = arith.addf %33, %38 : vector<16x128xf32>
      %cst_16 = arith.constant -5.000000e-01 : f32
      %40 = vector.broadcast %cst_16 : f32 to vector<16x128xf32>
      %41 = arith.mulf %40, %9 : vector<16x128xf32>
      %cst_17 = arith.constant 7.500000e-01 : f32
      %42 = vector.broadcast %cst_17 : f32 to vector<16x128xf32>
      %43 = arith.addf %41, %42 : vector<16x128xf32>
      %44 = arith.mulf %39, %39 : vector<16x128xf32>
      %45 = arith.mulf %43, %44 : vector<16x128xf32>
      %cst_18 = arith.constant 0.000000e+00 : f32
      %46 = vector.broadcast %cst_18 : f32 to vector<16x128xf32>
      %47 = arith.maximumf %8, %46 : vector<16x128xf32>
      %48 = arith.mulf %8, %9 : vector<16x128xf32>
      %49 = arith.subf %47, %48 : vector<16x128xf32>
      %50 = math.log1p %22 : vector<16x128xf32>
      %51 = arith.addf %49, %50 : vector<16x128xf32>
      %52 = arith.mulf %51, %45 : vector<16x128xf32>
      %53 = tpu.iota {dimensions = array<i32: 0>} : vector<16x128xi32>
      %54 = tpu.iota {dimensions = array<i32: 1>} : vector<16x128xi32>
      %c128_i32 = arith.constant 128 : i32
      %55 = vector.broadcast %c128_i32 : i32 to vector<16x128xi32>
      %56 = arith.muli %53, %55 : vector<16x128xi32>
      %57 = arith.addi %56, %54 : vector<16x128xi32>
      %58 = vector.broadcast %7 : i32 to vector<16x128xi32>
      %59 = arith.cmpi slt, %57, %58 : vector<16x128xi32>
      %cst_19 = arith.constant 0.000000e+00 : f32
      %60 = vector.broadcast %cst_19 : f32 to vector<16x128xf32>
      %61 = arith.select %59, %52, %60 : vector<16x128xi1>, vector<16x128xf32>
      %c0_20 = arith.constant 0 : index
      %c0_21 = arith.constant 0 : index
      %62 = vector.load %arg6[%c0_20, %c0_21] : memref<8x128xf32, #tpu.memory_space<vmem>>, vector<8x128xf32>
      %63 = vector.shape_cast %61 : vector<16x128xf32> to vector<2x8x128xf32>
      %cst_22 = arith.constant dense<0.000000e+00> : vector<8x128xf32>
      %64 = vector.multi_reduction <add>, %63, %cst_22 [0] : vector<2x8x128xf32> to vector<8x128xf32>
      %65 = arith.addf %62, %64 : vector<8x128xf32>
      %c0_23 = arith.constant 0 : index
      %c0_24 = arith.constant 0 : index
      %66 = vector.load %arg6[%c0_23, %c0_24] : memref<8x128xf32, #tpu.memory_space<vmem>>, vector<8x128xf32>
      tpu.vector_store %arg6[%c0_23, %c0_24], %65 {strides = array<i32>} : memref<8x128xf32, #tpu.memory_space<vmem>>, vector<8x128xf32>,
    } else {
    }
    %c0_i32_9 = arith.constant 0 : i32
    %16 = arith.cmpi eq, %arg1, %c0_i32_9 : i32
    %17 = arith.extui %16 : i1 to i32
    %c0_i32_10 = arith.constant 0 : i32
    %18 = arith.cmpi ne, %17, %c0_i32_10 : i32
    scf.if %18 {
      %c0_11 = arith.constant 0 : index
      %c0_12 = arith.constant 0 : index
      %19 = vector.load %arg6[%c0_11, %c0_12] : memref<8x128xf32, #tpu.memory_space<vmem>>, vector<8x128xf32>
      %c0_13 = arith.constant 0 : index
      %c0_14 = arith.constant 0 : index
      %c0_15 = arith.constant 0 : index
      %20 = vector.load %arg5[%c0_13, %c0_14, %c0_15] : memref<1x8x128xf32, #tpu.memory_space<vmem>>, vector<1x8x128xf32>
      %21 = vector.shape_cast %20 : vector<1x8x128xf32> to vector<8x128xf32>
      %22 = vector.shape_cast %19 : vector<8x128xf32> to vector<1x8x128xf32>
      tpu.vector_store %arg5[%c0_13, %c0_14, %c0_15], %22 {strides = array<i32>} : memref<1x8x128xf32, #tpu.memory_space<vmem>>, vector<1x8x128xf32>,
    } else {
    }
    return
  }
  func.func @transform_0(%arg0: i32, %arg1: i32, %arg2: memref<1xi32, #tpu.memory_space<smem>>) -> (i32, i32) {
    %c1_i32 = arith.constant 1 : i32
    %0 = arith.muli %arg0, %c1_i32 : i32
    %1 = arith.addi %0, %arg1 : i32
    %c0_i32 = arith.constant 0 : i32
    %2 = arith.minsi %1, %c0_i32 : i32
    %c0_i32_0 = arith.constant 0 : i32
    %c0_i32_1 = arith.constant 0 : i32
    return %2, %c0_i32_0 : i32, i32
  }
  func.func @transform_1(%arg0: i32, %arg1: i32, %arg2: memref<1xi32, #tpu.memory_space<smem>>) -> (i32, i32) {
    %c1_i32 = arith.constant 1 : i32
    %0 = arith.muli %arg0, %c1_i32 : i32
    %1 = arith.addi %0, %arg1 : i32
    %c0_i32 = arith.constant 0 : i32
    %2 = arith.minsi %1, %c0_i32 : i32
    %c0_i32_0 = arith.constant 0 : i32
    %c0_i32_1 = arith.constant 0 : i32
    return %2, %c0_i32_0 : i32, i32
  }
  func.func @transform_2(%arg0: i32, %arg1: i32, %arg2: memref<1xi32, #tpu.memory_space<smem>>) -> (i32, i32, i32) {
    %c0_i32 = arith.constant 0 : i32
    %c0_i32_0 = arith.constant 0 : i32
    %c0_i32_1 = arith.constant 0 : i32
    return %arg0, %c0_i32, %c0_i32_0 : i32, i32, i32
  }
}

</mosaic_0001>

<bundles_post_ra>
// kernel: tpu_custom_call.1
= control target key start
LH: loop header
LB: loop body
LE: loop exit
PB: predicated region body
PF: predicated region fallthrough
CT: control target
= control target key end

     0   :  { %9 = vsyncpa [#allocation6], 0  ;;  %s495_s0 = inlined_call_operand.<no memory space> [shape: s32[1], index: 0, kind: input, shape index: {}]   ;;  %s496_s1 = inlined_call_operand.hbm [shape: f32[16,128], index: 1, kind: input, shape index: {}]   ;;  %s497_s2 = inlined_call_operand.hbm [shape: f32[16,128], index: 2, kind: input, shape index: {}]   ;;  %s498_s3 = inlined_call_operand.hbm [shape: f32[1,8,128], index: 3, kind: output, shape index: {}]  }
   0x1   :  { %10 = vsyncpa [#allocation9], 0 }
   0x2   :  { %11 = vsyncpa [#allocation7], 0  ;;  %s370_s12 = smov [#allocation5]   ;;  %s298_s16 = scalar_lea.hbm %s496_s1, 256 }
   0x3   :  { %s23_s13 = sshll.u32 %s370_s12, 4  ;;  %p299_p0 = scmp.ne.s32.totalorder %s496_s1, %s298_s16  ;;  %s24_s13 = int_to_ptr.vmem [resolvable:$true] %s23_s13 }
   0x4   :  { %p302_p1 = scmp.lt.u32.totalorder %s298_s16, %s496_s1 }
   0x6   :  { %p304_p2 = pnand %p302_p1, %p299_p0 }
   0x8   :  { %307 = shalt.err (!%p304_p2)
}
   0x9   :  { %s308_s21 = scalar_lea.vmem %s24_s13, 256  ;;  %p313_p4 = scmp.lt.s32.totalorder %s24_s13, %s24_s13 }
   0xa   :  { %p309_p3 = scmp.ne.s32.totalorder %s24_s13, %s308_s21  ;;  %p314_p5 = scmp.lt.s32.totalorder %s308_s21, %s308_s21 }
   0xc   :  { %p315_p6 = por %p314_p5, %p313_p4 }
   0xe   :  { %p316_p7 = pnand %p315_p6, %p309_p3 }
  0x10   :  { %319 = shalt.err (!%p316_p7)
}
  0x11   :  { %s371_s22 = smov 128   ;;  %s372_s23 = smov 8  }
  0x12   :  { %29 = dma.hbm_to_vmem [thread:$0]  %s496_s1, 256, %s24_s13, [#allocation6], %s371_s22, %s371_s22, %s372_s23  }
  0x13   :  { %s373_s26 = smov [#allocation8]   ;;  %s320_s30 = scalar_lea.hbm %s497_s2, 256 }
  0x14   :  { %s41_s27 = sshll.u32 %s373_s26, 4  ;;  %p321_p8 = scmp.ne.s32.totalorder %s497_s2, %s320_s30  ;;  %s42_s27 = int_to_ptr.vmem [resolvable:$true] %s41_s27 }
  0x15   :  { %p324_p9 = scmp.lt.u32.totalorder %s320_s30, %s497_s2 }
  0x17   :  { %p326_p10 = pnand %p324_p9, %p321_p8 }
  0x19   :  { %329 = shalt.err (!%p326_p10)
}
  0x1a   :  { %s330_s8 = scalar_lea.vmem %s42_s27, 256  ;;  %p335_p12 = scmp.lt.s32.totalorder %s42_s27, %s42_s27 }
  0x1b   :  { %p331_p11 = scmp.ne.s32.totalorder %s42_s27, %s330_s8  ;;  %p336_p13 = scmp.lt.s32.totalorder %s330_s8, %s330_s8 }
  0x1d   :  { %p337_p0 = por %p336_p13, %p335_p12 }
  0x1f   :  { %p338_p1 = pnand %p337_p0, %p331_p11 }
  0x21   :  { %341 = shalt.err (!%p338_p1)
}
  0x22   :  { %47 = dma.hbm_to_vmem [thread:$0]  %s497_s2, 256, %s42_s27, [#allocation9], %s371_s22, %s371_s22, %s372_s23  }
  0x23   :  { %364 = dma.done.wait [#allocation6], 256  }
  0x24   :  { %365 = vsyncadd [#allocation6], 4294967040 }
  0x25   :  { %366 = dma.done.wait [#allocation9], 256  }
  0x26   :  { %367 = vsyncadd [#allocation9], 4294967040  ;;  %v374_v0 = vmov 0.0   ;;  %v420_v1 = vld [vmem:[#allocation5] sm:$0xff]  ;;  %v422_v2 = vld [vmem:[#allocation5 + $0x8] sm:$0xff]  ;;  %p266_p2 = scmp.lt.s32.totalorder %s495_s0, 2048 }
  0x27   :  { %66 = vst [vmem:[#allocation2] sm:$0xff] %v374_v0  ;;  %v424_v3 = vld [vmem:[#allocation8] sm:$0xff]  ;;  %v426_v4 = vld [vmem:[#allocation8 + $0x8] sm:$0xff]  ;;  %v79_v5 = vand.u32 (!%p266_p2), 2147483647, %v420_v1  ;;  %vm97_vm0 = vcmp.ge.f32.partialorder (!%p266_p2), %v420_v1, 0.0 }
  0x28   :  { %78 = sbr.rel (%p266_p2) target bundleno = 98 (0x62), region = 25  ;;  %v80_v6 = vand.u32 (!%p266_p2), 2147483647, %v422_v2  ;;  %vm98_vm1 = vcmp.ge.f32.partialorder (!%p266_p2), %v422_v2, 0.0  ;;  %v111_v33 = vmul.f32 (!%p266_p2), -0.5, %v424_v3  ;;  %v119_v34 = vmax.f32 (!%p266_p2), %v420_v1, 0.0 }
  0x29   :  { %v81_v7 = vsub.f32 (!%p266_p2), 0.0, %v79_v5  ;;  %v120_v38 = vmax.f32 (!%p266_p2), %v422_v2, 0.0  ;;  %v121_v39 = vmul.f32 (!%p266_p2), %v424_v3, %v420_v1  ;;  %v122_v41 = vmul.f32 (!%p266_p2), %v426_v4, %v422_v2 }
  0x2a   :  { %v82_v8 = vsub.f32 (!%p266_p2), 0.0, %v80_v6  ;;  %v112_v49 = vmul.f32 (!%p266_p2), -0.5, %v426_v4  ;;  %v113_v56 = vadd.f32 (!%p266_p2), 0.75, %v111_v33 }
  0x2b   :  { %v83_v9 = vmul.f32 (!%p266_p2), 1.442695, %v81_v7  ;;  %v123_v51 = vsub.f32 (!%p266_p2), %v119_v34, %v121_v39  ;;  %v124_v53 = vsub.f32 (!%p266_p2), %v120_v38, %v122_v41 }
  0x2c   :  { %v85_v10 = vmul.f32 (!%p266_p2), 1.442695, %v82_v8  ;;  %v114_v59 = vadd.f32 (!%p266_p2), 0.75, %v112_v49 }
  0x2d   :  { %274 = vpow2.f32 (!%p266_p2), %v83_v9 }
  0x2e   :  { %276 = vpow2.f32 (!%p266_p2), %v85_v10  ;;  %v147_v8 = vld [vmem:[#allocation2] sm:$0xff] (!%p266_p2) }
  0x37   :  { %v275_v11 = vpop.eup %274 }
  0x38   :  { %v277_v12 = vpop.eup %276  ;;  %v87_v13 = vadd.f32 1.0, %v275_v11  ;;  %v128_v20 = vmul.f32 -0.5, %v275_v11  ;;  %v131_v29 = vand.u32 2147483647, %v275_v11 }
  0x39   :  { %v88_v14 = vadd.f32 1.0, %v277_v12  ;;  %v137_v22 = vmul.f32 -0.5, %v277_v12  ;;  %v140_v35 = vand.u32 2147483647, %v277_v12 }
  0x3a   :  { %278 = vrcp.f32 %v87_v13  ;;  %v129_v26 = vadd.f32 1.0, %v128_v20  ;;  %vm442_vm2 = vcmp.lt.f32.partialorder %v131_v29, 0.0004427343 }
  0x3b   :  { %280 = vrcp.f32 %v88_v14  ;;  %v138_v30 = vadd.f32 1.0, %v137_v22  ;;  %vm141_vm3 = vcmp.lt.f32.partialorder %v140_v35, 0.0004427343 }
  0x3c   :  { %282 = vlog2.f32 %v87_v13  ;;  %v130_v43 = vmul.f32 %v275_v11, %v129_v26 }
  0x3d   :  { %284 = vlog2.f32 %v88_v14  ;;  %v139_v47 = vmul.f32 %v277_v12, %v138_v30 }
  0x44   :  { %v279_v15 = vpop.eup %278 }
  0x45   :  { %v281_v16 = vpop.eup %280  ;;  %v91_v17 = vmul.f32 %v279_v15, %v87_v13 }
  0x46   :  { %v92_v18 = vmul.f32 %v281_v16, %v88_v14  ;;  %v283_v27 = vpop.eup %282 }
  0x47   :  { %v93_v19 = vsub.f32 2.0, %v91_v17  ;;  %v285_v31 = vpop.eup %284  ;;  %v127_v42 = vmul.f32 0.6931472, %v283_v27 }
  0x48   :  { %v94_v21 = vsub.f32 2.0, %v92_v18  ;;  %v136_v46 = vmul.f32 0.6931472, %v285_v31 }
  0x49   :  { %v95_v23 = vmul.f32 %v279_v15, %v93_v19  ;;  %v133_v54 = vsel %vm442_vm2, %v130_v43, %v127_v42 }
  0x4a   :  { %v96_v24 = vmul.f32 %v281_v16, %v94_v21  ;;  %v142_v57 = vsel %vm141_vm3, %v139_v47, %v136_v46  ;;  %v143_v61 = vadd.f32 %v133_v54, %v123_v51 }
  0x4b   :  { %v99_v25 = vmul.f32 %v275_v11, %v95_v23  ;;  %v144_v63 = vadd.f32 %v142_v57, %v124_v53 }
  0x4c   :  { %v100_v28 = vmul.f32 %v277_v12, %v96_v24 }
  0x4d   :  { %v101_v32 = vsel %vm97_vm0, %v95_v23, %v99_v25 }
  0x4e   :  { %v102_v36 = vsel %vm98_vm1, %v96_v24, %v100_v28  ;;  %v103_v37 = vmul.f32 2.0, %v101_v32 }
  0x4f   :  { %v104_v40 = vmul.f32 2.0, %v102_v36 }
  0x50   :  { %v105_v44 = vsub.f32 1.0, %v103_v37 }
  0x51   :  { %v106_v48 = vsub.f32 1.0, %v104_v40 }
  0x52   :  { %v107_v50 = vmul.f32 %v105_v44, %v424_v3 }
  0x53   :  { %v108_v52 = vmul.f32 %v106_v48, %v426_v4 }
  0x54   :  { %v109_v55 = vadd.f32 %v107_v50, %v101_v32 }
  0x55   :  { %v110_v58 = vadd.f32 %v108_v52, %v102_v36 }
  0x56   :  { %v115_v60 = vmul.f32 %v109_v55, %v109_v55 }
  0x57   :  { %v116_v62 = vmul.f32 %v110_v58, %v110_v58 }
  0x58   :  { %v117_v0 = vmul.f32 %v115_v60, %v113_v56 }
  0x59   :  { %v118_v5 = vmul.f32 %v116_v62, %v114_v59 }
  0x5a   :  { %v145_v6 = vmul.f32 %v143_v61, %v117_v0 }
  0x5b   :  { %v146_v7 = vmul.f32 %v144_v63, %v118_v5 }
  0x5d   :  { %v148_v9 = vadd.f32 %v146_v7, %v145_v6 }
  0x5f   :  { %v149_v10 = vadd.f32 %v148_v9, %v147_v8 }
  0x61   :  { %150 = vst [vmem:[#allocation2] sm:$0xff] %v149_v10 }
  0x62 PF:  { %p267_p3 = scmp.ge.s32.totalorder %s495_s0, 2048 }
  0x63   :  { %v155_v11 = vand.u32 (!%p267_p3), 2147483647, %v420_v1  ;;  %v156_v12 = vand.u32 (!%p267_p3), 2147483647, %v422_v2  ;;  %v223_v25 = vlaneseq (!%p267_p3)  ;;  %vm173_vm4 = vcmp.ge.f32.partialorder (!%p267_p3), %v420_v1, 0.0 }
  0x64   :  { %154 = sbr.rel (%p267_p3) target bundleno = 159 (0x9f), region = 29  ;;  %vm174_vm5 = vcmp.ge.f32.partialorder (!%p267_p3), %v422_v2, 0.0  ;;  %v187_v34 = vmul.f32 (!%p267_p3), -0.5, %v424_v3  ;;  %v188_v38 = vmul.f32 (!%p267_p3), -0.5, %v426_v4  ;;  %v195_v43 = vmax.f32 (!%p267_p3), %v420_v1, 0.0 }
  0x65   :  { %v157_v13 = vsub.f32 (!%p267_p3), 0.0, %v155_v11  ;;  %v158_v14 = vsub.f32 (!%p267_p3), 0.0, %v156_v12  ;;  %v224_v32 = vshrl.u32 (!%p267_p3), %v223_v25, 7  ;;  %v196_v44 = vmax.f32 (!%p267_p3), %v422_v2, 0.0 }
  0x66   :  { %v197_v48 = vmul.f32 (!%p267_p3), %v424_v3, %v420_v1  ;;  %v198_v51 = vmul.f32 (!%p267_p3), %v426_v4, %v422_v2  ;;  %v227_v1 = vand.u32 (!%p267_p3), 127, %v223_v25  ;;  %v189_v7 = vadd.f32 (!%p267_p3), 0.75, %v187_v34 }
  0x67   :  { %v159_v15 = vmul.f32 (!%p267_p3), 1.442695, %v157_v13  ;;  %v161_v16 = vmul.f32 (!%p267_p3), 1.442695, %v158_v14  ;;  %v225_v49 = vadd.s32 (!%p267_p3), 8, %v224_v32  ;;  %v228_v60 = vmul.u32 (!%p267_p3), 128, %v224_v32 }
  0x68   :  { %v199_v62 = vsub.f32 (!%p267_p3), %v195_v43, %v197_v48  ;;  %v200_v0 = vsub.f32 (!%p267_p3), %v196_v44, %v198_v51  ;;  %v190_v10 = vadd.f32 (!%p267_p3), 0.75, %v188_v38 }
  0x69   :  { %286 = vpow2.f32 (!%p267_p3), %v159_v15  ;;  %v229_v2 = vmul.u32 (!%p267_p3), 128, %v225_v49  ;;  %v230_v11 = vadd.s32 (!%p267_p3), %v228_v60, %v227_v1 }
  0x6a   :  { %288 = vpow2.f32 (!%p267_p3), %v161_v16 }
  0x6b   :  { %v231_v14 = vadd.s32 %v229_v2, %v227_v1 }
  0x73   :  { %v287_v17 = vpop.eup %286 }
  0x74   :  { %v289_v18 = vpop.eup %288  ;;  %v163_v19 = vadd.f32 1.0, %v287_v17  ;;  %v204_v27 = vmul.f32 -0.5, %v287_v17  ;;  %v207_v39 = vand.u32 2147483647, %v287_v17 }
  0x75   :  { %v164_v20 = vadd.f32 1.0, %v289_v18  ;;  %v213_v29 = vmul.f32 -0.5, %v289_v18  ;;  %v216_v45 = vand.u32 2147483647, %v289_v18 }
  0x76   :  { %290 = vrcp.f32 %v163_v19  ;;  %v205_v35 = vadd.f32 1.0, %v204_v27  ;;  %vm466_vm6 = vcmp.lt.f32.partialorder %v207_v39, 0.0004427343 }
  0x77   :  { %292 = vrcp.f32 %v164_v20  ;;  %v214_v40 = vadd.f32 1.0, %v213_v29  ;;  %vm470_vm7 = vcmp.lt.f32.partialorder %v216_v45, 0.0004427343 }
  0x78   :  { %294 = vlog2.f32 %v163_v19  ;;  %v206_v53 = vmul.f32 %v287_v17, %v205_v35 }
  0x79   :  { %296 = vlog2.f32 %v164_v20  ;;  %v215_v57 = vmul.f32 %v289_v18, %v214_v40 }
  0x80   :  { %v291_v21 = vpop.eup %290 }
  0x81   :  { %v293_v22 = vpop.eup %292  ;;  %v167_v23 = vmul.f32 %v291_v21, %v163_v19 }
  0x82   :  { %v168_v24 = vmul.f32 %v293_v22, %v164_v20  ;;  %v295_v36 = vpop.eup %294 }
  0x83   :  { %v169_v26 = vsub.f32 2.0, %v167_v23  ;;  %v297_v41 = vpop.eup %296  ;;  %v203_v52 = vmul.f32 0.6931472, %v295_v36 }
  0x84   :  { %v170_v28 = vsub.f32 2.0, %v168_v24  ;;  %v212_v56 = vmul.f32 0.6931472, %v297_v41 }
  0x85   :  { %v171_v30 = vmul.f32 %v291_v21, %v169_v26  ;;  %v209_v5 = vsel %vm466_vm6, %v206_v53, %v203_v52 }
  0x86   :  { %v172_v31 = vmul.f32 %v293_v22, %v170_v28  ;;  %v218_v8 = vsel %vm470_vm7, %v215_v57, %v212_v56  ;;  %v219_v13 = vadd.f32 %v209_v5, %v199_v62  ;;  %v237_v22 = vld [vmem:[#allocation2] sm:$0xff] }
  0x87   :  { %v175_v33 = vmul.f32 %v287_v17, %v171_v30  ;;  %v220_v15 = vadd.f32 %v218_v8, %v200_v0 }
  0x88   :  { %v176_v37 = vmul.f32 %v289_v18, %v172_v31 }
  0x89   :  { %v177_v42 = vsel %vm173_vm4, %v171_v30, %v175_v33 }
  0x8a   :  { %v178_v46 = vsel %vm174_vm5, %v172_v31, %v176_v37  ;;  %v179_v47 = vmul.f32 2.0, %v177_v42 }
  0x8b   :  { %v180_v50 = vmul.f32 2.0, %v178_v46 }
  0x8c   :  { %v181_v54 = vsub.f32 1.0, %v179_v47 }
  0x8d   :  { %v182_v58 = vsub.f32 1.0, %v180_v50 }
  0x8e   :  { %v183_v61 = vmul.f32 %v181_v54, %v424_v3  ;;  %v232_v3 = vstv %s495_s0 }
  0x8f   :  { %v184_v63 = vmul.f32 %v182_v58, %v426_v4  ;;  %vm233_vm8 = vcmp.lt.s32.totalorder %v230_v11, %v232_v3  ;;  %vm234_vm9 = vcmp.lt.s32.totalorder %v231_v14, %v232_v3 }
  0x90   :  { %v185_v6 = vadd.f32 %v183_v61, %v177_v42 }
  0x91   :  { %v186_v9 = vadd.f32 %v184_v63, %v178_v46 }
  0x92   :  { %v191_v12 = vmul.f32 %v185_v6, %v185_v6 }
  0x93   :  { %v192_v4 = vmul.f32 %v186_v9, %v186_v9 }
  0x94   :  { %v193_v16 = vmul.f32 %v191_v12, %v189_v7 }
  0x95   :  { %v194_v17 = vmul.f32 %v192_v4, %v190_v10 }
  0x96   :  { %v221_v18 = vmul.f32 %v219_v13, %v193_v16 }
  0x97   :  { %v222_v19 = vmul.f32 %v220_v15, %v194_v17 }
  0x98   :  { %v235_v20 = vsel %vm233_vm8, %v221_v18, 0.0 }
  0x99   :  { %v236_v21 = vsel %vm234_vm9, %v222_v19, 0.0 }
  0x9a   :  { %v238_v23 = vadd.f32 %v236_v21, %v235_v20 }
  0x9c   :  { %v239_v24 = vadd.f32 %v238_v23, %v237_v22 }
  0x9e   :  { %240 = vst [vmem:[#allocation2] sm:$0xff] %v239_v24 }
  0x9f PF:  { %s375_s15 = smov [#allocation10]  }
  0xa0   :  { %s252_s16 = sshll.u32 %s375_s15, 4  ;;  %s253_s16 = int_to_ptr.vmem [resolvable:$true] %s252_s16 }
  0xa1   :  { %s342_s0 = scalar_lea.vmem %s253_s16, 128  ;;  %p347_p5 = scmp.lt.s32.totalorder %s253_s16, %s253_s16 }
  0xa2   :  { %p343_p4 = scmp.ne.s32.totalorder %s253_s16, %s342_s0  ;;  %p348_p6 = scmp.lt.s32.totalorder %s342_s0, %s342_s0 }
  0xa4   :  { %p349_p7 = por %p348_p6, %p347_p5 }
  0xa5   :  { %v244_v25 = vld [vmem:[#allocation2] sm:$0xff] }
  0xa6   :  { %245 = vst [vmem:[#allocation10] sm:$0xff] %v244_v25  ;;  %p350_p8 = pnand %p349_p7, %p343_p4 }
  0xa8   :  { %353 = shalt.err (!%p350_p8)
}
  0xa9   :  { %s354_s19 = scalar_lea.hbm %s498_s3, 128 }
  0xaa   :  { %p355_p9 = scmp.ne.s32.totalorder %s498_s3, %s354_s19  ;;  %p358_p10 = scmp.lt.u32.totalorder %s354_s19, %s498_s3 }
  0xac   :  { %p360_p11 = pnand %p358_p10, %p355_p9 }
  0xae   :  { %363 = shalt.err (!%p360_p11)
}
  0xaf   :  { %255 = dma.vmem_to_hbm [thread:$0]  %s253_s16, 128, %s498_s3, [#allocation7]  }
  0xb0   :  { %368 = dma.done.wait [#allocation7], 128  }
  0xb1   :  { %369 = vsyncadd [#allocation7], 4294967168 }
  0xb2   :  { %259 = vsyncpa [#allocation6], 1 }
  0xb3   :  { %260 = vsyncpa [#allocation9], 1 }
  0xb4   :  { %261 = vsyncpa [#allocation7], 1 }

</bundles_post_ra>
